<compile_context>
chip_gen: v7x
topology: tpu7x:2x2x1
jax: 0.10.0
libtpu: 0.0.40
codegen_flags: <defaults>
</compile_context>

<pallas_src>
import functools

import jax
import jax.numpy as jnp
from jax.experimental import pallas as pl
from jax.experimental.pallas import tpu as pltpu

BN_EPS = 1e-5


def _pad_unit(dim):
    # v6e/v7x MXU is 2x256x256: 256-aligned K/N tiles keep the array fully fed
    # for real feature sizes; 128 is the lane minimum (and the v5e MXU width).
    return 256 if dim >= 256 else 128


def _round_up(x, m):
    return (x + m - 1) // m * m


def _pad_dim(d):
    return _round_up(d, _pad_unit(d))


def _vmem_capacity_bytes():
    # v5e/v6e: 128 MiB per TensorCore, v7x: 64 MiB. Query when available,
    # fall back to the conservative (v7x) figure.
    try:
        cap = int(pltpu.get_tpu_info().vmem_capacity_bytes)
        if cap > 0:
            return cap
    except Exception:
        pass
    return 64 * 1024 * 1024


# ---------------------------------------------------------------------------
# Fused kernel (built per static num_layers / padded dims)
# ---------------------------------------------------------------------------
def _make_fused_mlp_kernel(num_layers, dims_pad):
    """Ref order:
         x_ref,
         w_hbm_0 .. w_hbm_{L-1}   (bf16, memory_space=ANY -> manually streamed),
         gb_ref                   (only if L > 1: stacked [g0; b0; g1; b1; ...]),
         b_last_ref,
         o_ref,
         wbuf (VMEM (2, max_in, max_out) bf16), sem (DMA sems (2,))
       dims_pad[i] = (p_in, p_out) padded dims of layer i (static)."""
    n_l = num_layers

    def kernel(*refs):
        x_ref = refs[0]
        w_refs = refs[1:1 + n_l]
        idx = 1 + n_l
        gb_ref = None
        if n_l > 1:
            gb_ref = refs[idx]
            idx += 1
        b_last_ref = refs[idx]
        o_ref = refs[idx + 1]
        wbuf = refs[idx + 2]
        sem = refs[idx + 3]

        # ---- manual double-buffered weight streaming (pattern P4) ----------
        copies = [None, None]

        def start_fetch(layer, slot):
            p_in, p_out = dims_pad[layer]
            cp = pltpu.make_async_copy(
                w_refs[layer], wbuf.at[slot, :p_in, :p_out], sem.at[slot])
            cp.start()
            copies[slot] = cp

        start_fetch(0, 0)

        # Activation stays resident (bf16) between layers; epilogue math f32.
        h = x_ref[...].astype(jnp.bfloat16)

        for li in range(n_l):
            slot = li & 1
            copies[slot].wait()
            if li + 1 < n_l:
                start_fetch(li + 1, 1 - slot)   # prefetch next layer's weights

            p_in, p_out = dims_pad[li]
            w = wbuf[slot, :p_in, :p_out]
            # bf16 operands, f32 accumulation on the MXU.
            y = jnp.dot(h, w, preferred_element_type=jnp.float32)

            if li < n_l - 1:
                # BatchNorm1d, training mode (biased variance over the batch).
                # Hidden-layer Linear bias is dropped (cancelled by the mean
                # subtraction).  Single-pass sum/sumsq stats; max(.,0) guards
                # cancellation (a centered two-pass is safer if activations
                # can grow very large).  rsqrt goes to the EUP slot.
                inv_n = jnp.float32(1.0 / y.shape[0])
                mean = jnp.sum(y, axis=0, keepdims=True) * inv_n
                var = jnp.sum(y * y, axis=0, keepdims=True) * inv_n - mean * mean
                var = jnp.maximum(var, 0.0)
                g = gb_ref[2 * li:2 * li + 1, :]         # (1, Hp)
                be = gb_ref[2 * li + 1:2 * li + 2, :]    # (1, Hp)
                # Fold the BN affine into one scale/shift on (1,Hp) rows so
                # only two full-size (N,Hp) VPU passes remain (fma + relu).
                scale = g * jax.lax.rsqrt(var + BN_EPS)
                shift = be - mean * scale
                h = jnp.maximum(y * scale + shift, 0.0).astype(jnp.bfloat16)
            else:
                o_ref[...] = (y + b_last_ref[...]).astype(o_ref.dtype)

    return kernel


# ---------------------------------------------------------------------------
# Wrapper: one pallas_call for the entire network
# ---------------------------------------------------------------------------
@functools.partial(jax.jit, static_argnames=("num_layers",))
def mlp_forward(x_pad, weights, gb, b_last, num_layers):
    """Fused forward.  Returns the lane-padded (N, out_pad) output; the caller
    slices off output_dim (keeps the kernel store lane-dense and the slice out
    of the hot path)."""
    n = x_pad.shape[0]
    dims_pad = tuple((w.shape[0], w.shape[1]) for w in weights)
    max_in = max(p for p, _ in dims_pad)
    max_out = max(p for _, p in dims_pad)
    out_pad = dims_pad[-1][1]

    inputs = [x_pad, *weights]
    in_specs = [pl.BlockSpec(memory_space=pltpu.VMEM)]
    in_specs += [pl.BlockSpec(memory_space=pl.ANY)] * len(weights)  # streamed
    if num_layers > 1:
        inputs.append(gb)
        in_specs.append(pl.BlockSpec(memory_space=pltpu.VMEM))
    inputs.append(b_last)
    in_specs.append(pl.BlockSpec(memory_space=pltpu.VMEM))

    # Advisory cost estimate for XLA scheduling around the custom call.
    flops = sum(2 * n * p_in * p_out for p_in, p_out in dims_pad)
    bytes_accessed = (x_pad.size * 4 + n * out_pad * 4 + b_last.size * 4
                      + sum(w.size * 2 for w in weights)
                      + (gb.size * 4 if num_layers > 1 else 0))
    transcendentals = sum(p_out for _, p_out in dims_pad[:-1])

    # VMEM actually resident: weights are streamed so the budget no longer
    # scales with the number of layers.
    resident = (x_pad.size * 4
                + 2 * max_in * max_out * 2                      # weight 2-slot buffer
                + (gb.size * 4 if num_layers > 1 else 0)
                + b_last.size * 4
                + n * out_pad * 4
                + 4 * n * max(max_in, max_out) * 4)             # y/h/stats temporaries
    vmem_cap = _vmem_capacity_bytes()
    # TODO(synk): add a batch-tiled grid fallback (with masked BN sum/sumsq
    # accumulation) for configurations where N*H activations overflow VMEM.
    assert resident < (vmem_cap * 3) // 4, "fused MLP does not fit VMEM"
    vmem_limit = int(min(max(2 * resident, 32 * 1024 * 1024), (vmem_cap * 7) // 8))

    kernel = _make_fused_mlp_kernel(num_layers, dims_pad)

    # TODO(synk): on v7x, split the batch over the 2 TensorCores (grid axis with
    # dimension_semantics=("parallel",)) exchanging per-core BN sum/sumsq
    # partials via VMEM_SHARED + core_barrier; the single un-gridded call below
    # runs on one TC.
    return pl.pallas_call(
        kernel,
        out_shape=jax.ShapeDtypeStruct((n, out_pad), jnp.float32),
        in_specs=in_specs,
        out_specs=pl.BlockSpec(memory_space=pltpu.VMEM),
        scratch_shapes=[
            pltpu.VMEM((2, max_in, max_out), jnp.bfloat16),     # weight double-buffer
            pltpu.SemaphoreType.DMA((2,)),
        ],
        compiler_params=pltpu.CompilerParams(vmem_limit_bytes=vmem_limit),
        cost_estimate=pl.CostEstimate(
            flops=int(flops),
            transcendentals=int(transcendentals),
            bytes_accessed=int(bytes_accessed)),
    )(*inputs)


# ---------------------------------------------------------------------------
# Parameter construction (mirrors nn.Linear / nn.BatchNorm1d init)
# ---------------------------------------------------------------------------
def init_mlp_params(key, num_layers, input_dim, hidden_dim, output_dim):
    """Returns:
       kernel params: (weights, gb, b_last)
         weights: tuple of bf16 (p_in, p_out) zero-padded weight matrices
                  (hidden-layer Linear biases are intentionally NOT passed:
                   they cancel against the BN mean subtraction)
         gb:      f32 (2*(L-1), hid_pad) stacked gamma/beta rows (None if L==1);
                  padded lanes use gamma=1, beta=0 so padded channels stay 0
         b_last:  f32 (1, out_pad) final-layer bias
       ref_params: (linears, bns) unpadded f32 for the pure-JAX reference
       pads:       (in_pad, hid_pad, out_pad)"""
    in_pad = _pad_dim(input_dim)
    hid_pad = _pad_dim(hidden_dim)
    out_pad = _pad_dim(output_dim)

    if num_layers == 1:
        dims = [(input_dim, output_dim, in_pad, out_pad)]
    else:
        dims = ([(input_dim, hidden_dim, in_pad, hid_pad)]
                + [(hidden_dim, hidden_dim, hid_pad, hid_pad)] * (num_layers - 2)
                + [(hidden_dim, output_dim, hid_pad, out_pad)])

    weights, gb_rows, lin_ref, bn_ref = [], [], [], []
    b_last = None
    for li, (d_in, d_out, p_in, p_out) in enumerate(dims):
        key, kw, kb = jax.random.split(key, 3)
        bound = 1.0 / float(d_in) ** 0.5
        w = jax.random.uniform(kw, (d_in, d_out), jnp.float32, -bound, bound)
        b = jax.random.uniform(kb, (d_out,), jnp.float32, -bound, bound)
        lin_ref.append((w, b))

        w_pad = jnp.zeros((p_in, p_out), jnp.float32).at[:d_in, :d_out].set(w)
        weights.append(w_pad.astype(jnp.bfloat16))          # bf16 MXU operand

        if li < num_layers - 1:
            gamma = jnp.ones((d_out,), jnp.float32)          # BatchNorm1d weight
            beta = jnp.zeros((d_out,), jnp.float32)          # BatchNorm1d bias
            bn_ref.append((gamma, beta))
            gb_rows.append(jnp.ones((p_out,), jnp.float32).at[:d_out].set(gamma))
            gb_rows.append(jnp.zeros((p_out,), jnp.float32).at[:d_out].set(beta))
            # hidden-layer bias b is used only by the reference (it cancels)
        else:
            b_last = jnp.zeros((1, p_out), jnp.float32).at[0, :d_out].set(b)

    gb = jnp.stack(gb_rows) if gb_rows else None
    return ((tuple(weights), gb, b_last),
            (lin_ref, bn_ref),
            (in_pad, hid_pad, out_pad))


# ---------------------------------------------------------------------------
# Pure-JAX f32 reference (same math as the PyTorch module in training mode)
# ---------------------------------------------------------------------------
def mlp_reference(h, ref_params, num_layers):
    linears, bns = ref_params
    if num_layers == 1:
        w, b = linears[0]
        return h @ w + b
    for layer in range(num_layers - 1):
        w, b = linears[layer]
        gamma, beta = bns[layer]
        y = h @ w + b
        mean = jnp.mean(y, axis=0, keepdims=True)
        var = jnp.mean((y - mean) ** 2, axis=0, keepdims=True)   # biased var
        y = (y - mean) / jnp.sqrt(var + BN_EPS) * gamma + beta
        h = jnp.maximum(y, 0.0)
    w, b = linears[num_layers - 1]
    return h @ w + b


if __name__ == "__main__":
    num_layers = 3
    batch, input_dim, hidden_dim, output_dim = 8, 16, 32, 8
    # NOTE: at this toy size the kernel is pure launch/DMA-overhead bound
    # (>85% of padded FLOPs land on zero lanes); benchmark with larger
    # N / hidden_dim before drawing performance conclusions.

    key = jax.random.PRNGKey(0)
    key, kx = jax.random.split(key)
    h = jax.random.normal(kx, (batch, input_dim), jnp.float32)

    (weights, gb, b_last), ref_params, (in_pad, _, _) = init_mlp_params(
        key, num_layers, input_dim, hidden_dim, output_dim)

    x_pad = jnp.zeros((batch, in_pad), jnp.float32).at[:, :input_dim].set(h)

    out_padded = mlp_forward(x_pad, weights, gb, b_last, num_layers=num_layers)
    out_padded = jax.block_until_ready(out_padded)
    out = out_padded[:, :output_dim]          # slice outside the fused kernel

    ref = mlp_reference(h, ref_params, num_layers)
    assert out.shape == (batch, output_dim)
    # bf16 MXU operands (f32 accumulation) vs the pure-f32 reference -> loose tol.
    max_diff = float(jnp.max(jnp.abs(out - ref)))
    assert jnp.allclose(out, ref, atol=5e-2, rtol=5e-2), max_diff

    print("KERNEL_OK")
</pallas_src>

<mosaic_0001>
module attributes {stable_mosaic.version = 11 : i64} {
  func.func @kernel(%arg0: memref<8x128xf32, #tpu.memory_space<vmem>>, %arg1: memref<128x128xbf16, #tpu.memory_space<any>>, %arg2: memref<128x128xbf16, #tpu.memory_space<any>>, %arg3: memref<128x128xbf16, #tpu.memory_space<any>>, %arg4: memref<4x128xf32, #tpu.memory_space<vmem>>, %arg5: memref<1x128xf32, #tpu.memory_space<vmem>>, %arg6: memref<8x128xf32, #tpu.memory_space<vmem>>, %arg7: memref<2x128x128xbf16, #tpu.memory_space<vmem>>, %arg8: memref<2x!tpu.dma_semaphore, #tpu.memory_space<semaphore_mem>>) attributes {dimension_semantics = [], scalar_prefetch = 0 : i64, scratch_operands = 2 : i64, tpu.core_type = #tpu.core_type<tc>} {
    %c0_i32 = arith.constant 0 : i32
    %c0_i32_0 = arith.constant 0 : i32
    %c0_i32_1 = arith.constant 0 : i32
    %c0_i32_2 = arith.constant 0 : i32
    %0 = tpu.memref_slice %arg7[%c0_i32, %c0_i32_1, %c0_i32_2] : memref<2x128x128xbf16, #tpu.memory_space<vmem>> -> memref<1x128x128xbf16, #tpu.memory_space<vmem>>
    %1 = tpu.memref_squeeze %0 : memref<1x128x128xbf16, #tpu.memory_space<vmem>> -> memref<128x128xbf16, #tpu.memory_space<vmem>>
    %2 = tpu.memref_slice %arg8[%c0_i32_0] : memref<2x!tpu.dma_semaphore, #tpu.memory_space<semaphore_mem>> -> memref<1x!tpu.dma_semaphore, #tpu.memory_space<semaphore_mem>>
    %3 = tpu.memref_squeeze %2 : memref<1x!tpu.dma_semaphore, #tpu.memory_space<semaphore_mem>> -> memref<!tpu.dma_semaphore, #tpu.memory_space<semaphore_mem>>
    tpu.enqueue_dma source(%arg1 : memref<128x128xbf16, #tpu.memory_space<any>>) target(%1 : memref<128x128xbf16, #tpu.memory_space<vmem>>) target_semaphore(%3 : memref<!tpu.dma_semaphore, #tpu.memory_space<semaphore_mem>>)
    %c0 = arith.constant 0 : index
    %c0_3 = arith.constant 0 : index
    %4 = vector.load %arg0[%c0, %c0_3] : memref<8x128xf32, #tpu.memory_space<vmem>>, vector<8x128xf32>
    %5 = arith.truncf %4 : vector<8x128xf32> to vector<8x128xbf16>
    %c0_i32_4 = arith.constant 0 : i32
    %c0_i32_5 = arith.constant 0 : i32
    %c0_i32_6 = arith.constant 0 : i32
    %c0_i32_7 = arith.constant 0 : i32
    %6 = tpu.memref_slice %arg7[%c0_i32_4, %c0_i32_6, %c0_i32_7] : memref<2x128x128xbf16, #tpu.memory_space<vmem>> -> memref<1x128x128xbf16, #tpu.memory_space<vmem>>
    %7 = tpu.memref_squeeze %6 : memref<1x128x128xbf16, #tpu.memory_space<vmem>> -> memref<128x128xbf16, #tpu.memory_space<vmem>>
    %8 = tpu.memref_slice %arg8[%c0_i32_5] : memref<2x!tpu.dma_semaphore, #tpu.memory_space<semaphore_mem>> -> memref<1x!tpu.dma_semaphore, #tpu.memory_space<semaphore_mem>>
    %9 = tpu.memref_squeeze %8 : memref<1x!tpu.dma_semaphore, #tpu.memory_space<semaphore_mem>> -> memref<!tpu.dma_semaphore, #tpu.memory_space<semaphore_mem>>
    tpu.wait_dma2 semaphore(%9 : memref<!tpu.dma_semaphore, #tpu.memory_space<semaphore_mem>>) src(%arg1 : memref<128x128xbf16, #tpu.memory_space<any>>) dst(%7 : memref<128x128xbf16, #tpu.memory_space<vmem>>)
    %c1_i32 = arith.constant 1 : i32
    %c1_i32_8 = arith.constant 1 : i32
    %c0_i32_9 = arith.constant 0 : i32
    %c0_i32_10 = arith.constant 0 : i32
    %10 = tpu.memref_slice %arg7[%c1_i32, %c0_i32_9, %c0_i32_10] : memref<2x128x128xbf16, #tpu.memory_space<vmem>> -> memref<1x128x128xbf16, #tpu.memory_space<vmem>>
    %11 = tpu.memref_squeeze %10 : memref<1x128x128xbf16, #tpu.memory_space<vmem>> -> memref<128x128xbf16, #tpu.memory_space<vmem>>
    %12 = tpu.memref_slice %arg8[%c1_i32_8] : memref<2x!tpu.dma_semaphore, #tpu.memory_space<semaphore_mem>> -> memref<1x!tpu.dma_semaphore, #tpu.memory_space<semaphore_mem>>
    %13 = tpu.memref_squeeze %12 : memref<1x!tpu.dma_semaphore, #tpu.memory_space<semaphore_mem>> -> memref<!tpu.dma_semaphore, #tpu.memory_space<semaphore_mem>>
    tpu.enqueue_dma source(%arg2 : memref<128x128xbf16, #tpu.memory_space<any>>) target(%11 : memref<128x128xbf16, #tpu.memory_space<vmem>>) target_semaphore(%13 : memref<!tpu.dma_semaphore, #tpu.memory_space<semaphore_mem>>)
    %c0_11 = arith.constant 0 : index
    %c0_12 = arith.constant 0 : index
    %c0_13 = arith.constant 0 : index
    %14 = vector.load %arg7[%c0_11, %c0_12, %c0_13] : memref<2x128x128xbf16, #tpu.memory_space<vmem>>, vector<1x128x128xbf16>
    %15 = vector.shape_cast %14 : vector<1x128x128xbf16> to vector<128x128xbf16>
    %cst = arith.constant dense<0.000000e+00> : vector<8x128xf32>
    %16 = tpu.matmul %5, %15, %cst {dimension_numbers = #tpu.dot_dimension_numbers<[1], [0], [0], [1], [0, 0, 1, 1], [], []>} : vector<8x128xbf16>, vector<128x128xbf16>, vector<8x128xf32> -> vector<8x128xf32>
    %cst_14 = arith.constant dense<0.000000e+00> : vector<128xf32>
    %17 = vector.multi_reduction <add>, %16, %cst_14 [0] : vector<8x128xf32> to vector<128xf32>
    %18 = vector.shape_cast %17 : vector<128xf32> to vector<1x128xf32>
    %cst_15 = arith.constant 1.250000e-01 : f32
    %19 = vector.broadcast %cst_15 : f32 to vector<1x128xf32>
    %20 = arith.mulf %18, %19 : vector<1x128xf32>
    %21 = arith.mulf %16, %16 : vector<8x128xf32>
    %cst_16 = arith.constant dense<0.000000e+00> : vector<128xf32>
    %22 = vector.multi_reduction <add>, %21, %cst_16 [0] : vector<8x128xf32> to vector<128xf32>
    %23 = vector.shape_cast %22 : vector<128xf32> to vector<1x128xf32>
    %cst_17 = arith.constant 1.250000e-01 : f32
    %24 = vector.broadcast %cst_17 : f32 to vector<1x128xf32>
    %25 = arith.mulf %23, %24 : vector<1x128xf32>
    %26 = arith.mulf %20, %20 : vector<1x128xf32>
    %27 = arith.subf %25, %26 : vector<1x128xf32>
    %cst_18 = arith.constant 0.000000e+00 : f32
    %28 = vector.broadcast %cst_18 : f32 to vector<1x128xf32>
    %29 = arith.maximumf %27, %28 : vector<1x128xf32>
    %c0_19 = arith.constant 0 : index
    %c0_20 = arith.constant 0 : index
    %30 = vector.load %arg4[%c0_19, %c0_20] : memref<4x128xf32, #tpu.memory_space<vmem>>, vector<1x128xf32>
    %c1 = arith.constant 1 : index
    %c0_21 = arith.constant 0 : index
    %31 = vector.load %arg4[%c1, %c0_21] : memref<4x128xf32, #tpu.memory_space<vmem>>, vector<1x128xf32>
    %cst_22 = arith.constant 9.99999974E-6 : f32
    %32 = vector.broadcast %cst_22 : f32 to vector<1x128xf32>
    %33 = arith.addf %29, %32 : vector<1x128xf32>
    %34 = math.rsqrt %33 : vector<1x128xf32>
    %35 = arith.mulf %30, %34 : vector<1x128xf32>
    %36 = arith.mulf %20, %35 : vector<1x128xf32>
    %37 = arith.subf %31, %36 : vector<1x128xf32>
    %38 = vector.broadcast %35 : vector<1x128xf32> to vector<8x128xf32>
    %39 = arith.mulf %16, %38 : vector<8x128xf32>
    %40 = vector.broadcast %37 : vector<1x128xf32> to vector<8x128xf32>
    %41 = arith.addf %39, %40 : vector<8x128xf32>
    %cst_23 = arith.constant 0.000000e+00 : f32
    %42 = vector.broadcast %cst_23 : f32 to vector<8x128xf32>
    %43 = arith.maximumf %41, %42 : vector<8x128xf32>
    %44 = arith.truncf %43 : vector<8x128xf32> to vector<8x128xbf16>
    %c1_i32_24 = arith.constant 1 : i32
    %c1_i32_25 = arith.constant 1 : i32
    %c0_i32_26 = arith.constant 0 : i32
    %c0_i32_27 = arith.constant 0 : i32
    %45 = tpu.memref_slice %arg7[%c1_i32_24, %c0_i32_26, %c0_i32_27] : memref<2x128x128xbf16, #tpu.memory_space<vmem>> -> memref<1x128x128xbf16, #tpu.memory_space<vmem>>
    %46 = tpu.memref_squeeze %45 : memref<1x128x128xbf16, #tpu.memory_space<vmem>> -> memref<128x128xbf16, #tpu.memory_space<vmem>>
    %47 = tpu.memref_slice %arg8[%c1_i32_25] : memref<2x!tpu.dma_semaphore, #tpu.memory_space<semaphore_mem>> -> memref<1x!tpu.dma_semaphore, #tpu.memory_space<semaphore_mem>>
    %48 = tpu.memref_squeeze %47 : memref<1x!tpu.dma_semaphore, #tpu.memory_space<semaphore_mem>> -> memref<!tpu.dma_semaphore, #tpu.memory_space<semaphore_mem>>
    tpu.wait_dma2 semaphore(%48 : memref<!tpu.dma_semaphore, #tpu.memory_space<semaphore_mem>>) src(%arg2 : memref<128x128xbf16, #tpu.memory_space<any>>) dst(%46 : memref<128x128xbf16, #tpu.memory_space<vmem>>)
    %c0_i32_28 = arith.constant 0 : i32
    %c0_i32_29 = arith.constant 0 : i32
    %c0_i32_30 = arith.constant 0 : i32
    %c0_i32_31 = arith.constant 0 : i32
    %49 = tpu.memref_slice %arg7[%c0_i32_28, %c0_i32_30, %c0_i32_31] : memref<2x128x128xbf16, #tpu.memory_space<vmem>> -> memref<1x128x128xbf16, #tpu.memory_space<vmem>>
    %50 = tpu.memref_squeeze %49 : memref<1x128x128xbf16, #tpu.memory_space<vmem>> -> memref<128x128xbf16, #tpu.memory_space<vmem>>
    %51 = tpu.memref_slice %arg8[%c0_i32_29] : memref<2x!tpu.dma_semaphore, #tpu.memory_space<semaphore_mem>> -> memref<1x!tpu.dma_semaphore, #tpu.memory_space<semaphore_mem>>
    %52 = tpu.memref_squeeze %51 : memref<1x!tpu.dma_semaphore, #tpu.memory_space<semaphore_mem>> -> memref<!tpu.dma_semaphore, #tpu.memory_space<semaphore_mem>>
    tpu.enqueue_dma source(%arg3 : memref<128x128xbf16, #tpu.memory_space<any>>) target(%50 : memref<128x128xbf16, #tpu.memory_space<vmem>>) target_semaphore(%52 : memref<!tpu.dma_semaphore, #tpu.memory_space<semaphore_mem>>)
    %c1_32 = arith.constant 1 : index
    %c0_33 = arith.constant 0 : index
    %c0_34 = arith.constant 0 : index
    %53 = vector.load %arg7[%c1_32, %c0_33, %c0_34] : memref<2x128x128xbf16, #tpu.memory_space<vmem>>, vector<1x128x128xbf16>
    %54 = vector.shape_cast %53 : vector<1x128x128xbf16> to vector<128x128xbf16>
    %cst_35 = arith.constant dense<0.000000e+00> : vector<8x128xf32>
    %55 = tpu.matmul %44, %54, %cst_35 {dimension_numbers = #tpu.dot_dimension_numbers<[1], [0], [0], [1], [0, 0, 1, 1], [], []>} : vector<8x128xbf16>, vector<128x128xbf16>, vector<8x128xf32> -> vector<8x128xf32>
    %cst_36 = arith.constant dense<0.000000e+00> : vector<128xf32>
    %56 = vector.multi_reduction <add>, %55, %cst_36 [0] : vector<8x128xf32> to vector<128xf32>
    %57 = vector.shape_cast %56 : vector<128xf32> to vector<1x128xf32>
    %cst_37 = arith.constant 1.250000e-01 : f32
    %58 = vector.broadcast %cst_37 : f32 to vector<1x128xf32>
    %59 = arith.mulf %57, %58 : vector<1x128xf32>
    %60 = arith.mulf %55, %55 : vector<8x128xf32>
    %cst_38 = arith.constant dense<0.000000e+00> : vector<128xf32>
    %61 = vector.multi_reduction <add>, %60, %cst_38 [0] : vector<8x128xf32> to vector<128xf32>
    %62 = vector.shape_cast %61 : vector<128xf32> to vector<1x128xf32>
    %cst_39 = arith.constant 1.250000e-01 : f32
    %63 = vector.broadcast %cst_39 : f32 to vector<1x128xf32>
    %64 = arith.mulf %62, %63 : vector<1x128xf32>
    %65 = arith.mulf %59, %59 : vector<1x128xf32>
    %66 = arith.subf %64, %65 : vector<1x128xf32>
    %cst_40 = arith.constant 0.000000e+00 : f32
    %67 = vector.broadcast %cst_40 : f32 to vector<1x128xf32>
    %68 = arith.maximumf %66, %67 : vector<1x128xf32>
    %c2 = arith.constant 2 : index
    %c0_41 = arith.constant 0 : index
    %69 = vector.load %arg4[%c2, %c0_41] : memref<4x128xf32, #tpu.memory_space<vmem>>, vector<1x128xf32>
    %c3 = arith.constant 3 : index
    %c0_42 = arith.constant 0 : index
    %70 = vector.load %arg4[%c3, %c0_42] : memref<4x128xf32, #tpu.memory_space<vmem>>, vector<1x128xf32>
    %cst_43 = arith.constant 9.99999974E-6 : f32
    %71 = vector.broadcast %cst_43 : f32 to vector<1x128xf32>
    %72 = arith.addf %68, %71 : vector<1x128xf32>
    %73 = math.rsqrt %72 : vector<1x128xf32>
    %74 = arith.mulf %69, %73 : vector<1x128xf32>
    %75 = arith.mulf %59, %74 : vector<1x128xf32>
    %76 = arith.subf %70, %75 : vector<1x128xf32>
    %77 = vector.broadcast %74 : vector<1x128xf32> to vector<8x128xf32>
    %78 = arith.mulf %55, %77 : vector<8x128xf32>
    %79 = vector.broadcast %76 : vector<1x128xf32> to vector<8x128xf32>
    %80 = arith.addf %78, %79 : vector<8x128xf32>
    %cst_44 = arith.constant 0.000000e+00 : f32
    %81 = vector.broadcast %cst_44 : f32 to vector<8x128xf32>
    %82 = arith.maximumf %80, %81 : vector<8x128xf32>
    %83 = arith.truncf %82 : vector<8x128xf32> to vector<8x128xbf16>
    %c0_i32_45 = arith.constant 0 : i32
    %c0_i32_46 = arith.constant 0 : i32
    %c0_i32_47 = arith.constant 0 : i32
    %c0_i32_48 = arith.constant 0 : i32
    %84 = tpu.memref_slice %arg7[%c0_i32_45, %c0_i32_47, %c0_i32_48] : memref<2x128x128xbf16, #tpu.memory_space<vmem>> -> memref<1x128x128xbf16, #tpu.memory_space<vmem>>
    %85 = tpu.memref_squeeze %84 : memref<1x128x128xbf16, #tpu.memory_space<vmem>> -> memref<128x128xbf16, #tpu.memory_space<vmem>>
    %86 = tpu.memref_slice %arg8[%c0_i32_46] : memref<2x!tpu.dma_semaphore, #tpu.memory_space<semaphore_mem>> -> memref<1x!tpu.dma_semaphore, #tpu.memory_space<semaphore_mem>>
    %87 = tpu.memref_squeeze %86 : memref<1x!tpu.dma_semaphore, #tpu.memory_space<semaphore_mem>> -> memref<!tpu.dma_semaphore, #tpu.memory_space<semaphore_mem>>
    tpu.wait_dma2 semaphore(%87 : memref<!tpu.dma_semaphore, #tpu.memory_space<semaphore_mem>>) src(%arg3 : memref<128x128xbf16, #tpu.memory_space<any>>) dst(%85 : memref<128x128xbf16, #tpu.memory_space<vmem>>)
    %c0_49 = arith.constant 0 : index
    %c0_50 = arith.constant 0 : index
    %c0_51 = arith.constant 0 : index
    %88 = vector.load %arg7[%c0_49, %c0_50, %c0_51] : memref<2x128x128xbf16, #tpu.memory_space<vmem>>, vector<1x128x128xbf16>
    %89 = vector.shape_cast %88 : vector<1x128x128xbf16> to vector<128x128xbf16>
    %cst_52 = arith.constant dense<0.000000e+00> : vector<8x128xf32>
    %90 = tpu.matmul %83, %89, %cst_52 {dimension_numbers = #tpu.dot_dimension_numbers<[1], [0], [0], [1], [0, 0, 1, 1], [], []>} : vector<8x128xbf16>, vector<128x128xbf16>, vector<8x128xf32> -> vector<8x128xf32>
    %c0_53 = arith.constant 0 : index
    %c0_54 = arith.constant 0 : index
    %91 = vector.load %arg5[%c0_53, %c0_54] : memref<1x128xf32, #tpu.memory_space<vmem>>, vector<1x128xf32>
    %92 = vector.broadcast %91 : vector<1x128xf32> to vector<8x128xf32>
    %93 = arith.addf %90, %92 : vector<8x128xf32>
    %c0_55 = arith.constant 0 : index
    %c0_56 = arith.constant 0 : index
    %94 = vector.load %arg6[%c0_55, %c0_56] : memref<8x128xf32, #tpu.memory_space<vmem>>, vector<8x128xf32>
    tpu.vector_store %arg6[%c0_55, %c0_56], %93 {strides = array<i32>} : memref<8x128xf32, #tpu.memory_space<vmem>>, vector<8x128xf32>,
    return
  }
}

</mosaic_0001>

<bundles_post_ra>
// kernel: mlp_forward.1
= control target key start
LH: loop header
LB: loop body
LE: loop exit
PB: predicated region body
PF: predicated region fallthrough
CT: control target
= control target key end

     0   :  { %11 = vsyncpa [#allocation5], 0  ;;  %s734_s0 = inlined_call_operand.hbm [shape: f32[8,128], index: 0, kind: input, shape index: {}]   ;;  %s735_s1 = inlined_call_operand.hbm [shape: bf16[128,128], index: 1, kind: input, shape index: {}]   ;;  %s736_s2 = inlined_call_operand.hbm [shape: bf16[128,128], index: 2, kind: input, shape index: {}]   ;;  %s737_s3 = inlined_call_operand.hbm [shape: bf16[128,128], index: 3, kind: input, shape index: {}]   ;;  %s738_s4 = inlined_call_operand.vmem [shape: f32[4,128], index: 4, kind: input, shape index: {}]   ;;  %s739_s5 = inlined_call_operand.vmem [shape: f32[1,128], index: 5, kind: input, shape index: {}]   ;;  %s740_s6 = inlined_call_operand.hbm [shape: f32[8,128], index: 6, kind: output, shape index: {}]  }
   0x1   :  { %12 = vsyncpa [#allocation6], 0  ;;  %s550_s21 = smov [#allocation4]   ;;  %s430_s25 = scalar_lea.hbm %s734_s0, 128 }
   0x2   :  { %s19_s22 = sshll.u32 %s550_s21, 4  ;;  %p431_p0 = scmp.ne.s32.totalorder %s734_s0, %s430_s25  ;;  %s20_s22 = int_to_ptr.vmem [resolvable:$true] %s19_s22 }
   0x3   :  { %p434_p1 = scmp.lt.u32.totalorder %s430_s25, %s734_s0 }
   0x5   :  { %p436_p2 = pnand %p434_p1, %p431_p0 }
   0x7   :  { %439 = shalt.err (!%p436_p2)
}
   0x8   :  { %s440_s30 = scalar_lea.vmem %s20_s22, 128  ;;  %p445_p4 = scmp.lt.s32.totalorder %s20_s22, %s20_s22 }
   0x9   :  { %p441_p3 = scmp.ne.s32.totalorder %s20_s22, %s440_s30  ;;  %p446_p5 = scmp.lt.s32.totalorder %s440_s30, %s440_s30 }
   0xb   :  { %p447_p6 = por %p446_p5, %p445_p4 }
   0xd   :  { %p448_p7 = pnand %p447_p6, %p441_p3 }
   0xf   :  { %451 = shalt.err (!%p448_p7)
}
  0x10   :  { %22 = dma.hbm_to_vmem [thread:$0]  %s734_s0, 128, %s20_s22, [#allocation5]  }
  0x11   :  { %540 = dma.done.wait [#allocation5], 128  }
  0x12   :  { %541 = vsyncadd [#allocation5], 4294967168  ;;  %s551_s9 = smov [#allocation2]   ;;  %s452_s13 = scalar_lea.hbm %s735_s1, 1024 }
  0x13   :  { %s38_s10 = sshll.u32 %s551_s9, 4  ;;  %p453_p8 = scmp.ne.s32.totalorder %s735_s1, %s452_s13  ;;  %s603_s10 = int_to_ptr.vmem [resolvable:$true] %s38_s10 }
  0x14   :  { %p456_p9 = scmp.lt.u32.totalorder %s452_s13, %s735_s1 }
  0x16   :  { %p458_p10 = pnand %p456_p9, %p453_p8 }
  0x18   :  { %461 = shalt.err (!%p458_p10)  }
  0x19   :  { %s462_s0 = scalar_lea.vmem %s603_s10, 1024  ;;  %s466_s19 = scalar_lea.vmem %s603_s10, 2048 }
  0x1a   :  { %p616_p11 = scmp.ne.s32.totalorder %s603_s10, %s462_s0  ;;  %p467_p12 = scmp.lt.s32.totalorder %s603_s10, %s603_s10 }
  0x1b   :  { %p468_p13 = scmp.lt.s32.totalorder %s466_s19, %s462_s0 }
  0x1d   :  { %p623_p0 = por %p468_p13, %p467_p12 }
  0x1f   :  { %p470_p1 = pnand %p623_p0, %p616_p11 }
  0x21   :  { %473 = shalt.err (!%p470_p1)  }
  0x22   :  { %41 = dma.hbm_to_vmem [thread:$0]  %s735_s1, 1024, %s603_s10, [#allocation3]  ;;  %v42_v0 = vld [vmem:[#allocation4] sm:$0xff] }
  0x23   :  { %v43_v1 = vpack.c.bf16 %v42_v0, %v42_v0 }
  0x24   :  { %542 = dma.done.wait [#allocation3], 1024 }
  0x25   :  { %543 = vsyncadd [#allocation3], 4294966272  ;;  %s552_s23 = smov [#allocation2 + $0x40]   ;;  %v553_v2 = vmov 0.0   ;;  %vm554_vm0 = vmmov 0   ;;  %s474_s27 = scalar_lea.hbm %s736_s2, 1024 }
  0x26   :  { %s57_s24 = sshll.u32 %s552_s23, 4  ;;  %360 = vmatprep.subr.bf16.mxu0 %v553_v2  ;;  %376 = vmatprep.mubr.msk.bf16.mxu0 %vm554_vm0, %v553_v2  ;;  %p475_p2 = scmp.ne.s32.totalorder %s736_s2, %s474_s27  ;;  %s58_s24 = int_to_ptr.vmem [resolvable:$true] %s57_s24 }
  0x27   :  { %p478_p3 = scmp.lt.u32.totalorder %s474_s27, %s736_s2 }
  0x29   :  { %p480_p4 = pnand %p478_p3, %p475_p2 }
  0x2b   :  { %483 = shalt.err (!%p480_p4)  }
  0x2c   :  { %s484_s7 = scalar_lea.vmem %s58_s24, 1024  ;;  %p489_p6 = scmp.lt.s32.totalorder %s58_s24, %s603_s10 }
  0x2d   :  { %p485_p5 = scmp.ne.s32.totalorder %s58_s24, %s484_s7  ;;  %p490_p7 = scmp.lt.s32.totalorder %s466_s19, %s484_s7 }
  0x2f   :  { %p491_p8 = por %p490_p7, %p489_p6 }
  0x31   :  { %p492_p9 = pnand %p491_p8, %p485_p5 }
  0x33   :  { %495 = shalt.err (!%p492_p9)  }
  0x34   :  { %60 = dma.hbm_to_vmem [thread:$0]  %s736_s2, 1024, %s58_s24, [#allocation3 + $0x1]  ;;  %v134_v34 = vlaneseq  ;;  %v127_v36 = vld [vmem:[%s738_s4] sm:$0x1]  ;;  %v128_v40 = vld [vmem:[%s738_s4 + $0x1] sm:$0x1] }
  0x35   :  { %v61_v3 = vld [vmem:[#allocation2] sm:$0xff]  ;;  %v62_v4 = vld [vmem:[#allocation2 + $0x8] sm:$0xff]  ;;  %v63_v5 = vld [vmem:[#allocation2 + $0x10] sm:$0xff] }
  0x36   :  { %361 = vmatpush3.bf16.msra.mxu0 %v61_v3  ;;  %v64_v6 = vld [vmem:[#allocation2 + $0x18] sm:$0xff]  ;;  %v65_v7 = vld [vmem:[#allocation2 + $0x20] sm:$0xff]  ;;  %v66_v8 = vld [vmem:[#allocation2 + $0x28] sm:$0xff]  ;;  %v135_v35 = vshrl.u32 %v134_v34, 7 }
  0x37   :  { %362 = vmatprep.subr.bf16.mxu0 %v553_v2  ;;  %v67_v9 = vld [vmem:[#allocation2 + $0x30] sm:$0xff]  ;;  %v68_v10 = vld [vmem:[#allocation2 + $0x38] sm:$0xff] }
  0x38   :  { %v666_v37 = vsub.s32 0, %v135_v35 }
  0x3a   :  { %363 = vmatpush3.bf16.msra.mxu0 %v62_v4 }
  0x3b   :  { %364 = vmatprep.subr.bf16.mxu0 %v553_v2 }
  0x3e   :  { %365 = vmatpush3.bf16.msra.mxu0 %v63_v5 }
  0x3f   :  { %366 = vmatprep.subr.bf16.mxu0 %v553_v2 }
  0x42   :  { %367 = vmatpush3.bf16.msra.mxu0 %v64_v6 }
  0x43   :  { %368 = vmatprep.subr.bf16.mxu0 %v553_v2 }
  0x46   :  { %369 = vmatpush3.bf16.msra.mxu0 %v65_v7 }
  0x47   :  { %370 = vmatprep.subr.bf16.mxu0 %v553_v2 }
  0x4a   :  { %371 = vmatpush3.bf16.msra.mxu0 %v66_v8 }
  0x4b   :  { %372 = vmatprep.subr.bf16.mxu0 %v553_v2 }
  0x4e   :  { %373 = vmatpush3.bf16.msra.mxu0 %v67_v9 }
  0x4f   :  { %374 = vmatprep.subr.bf16.mxu0 %v553_v2 }
  0x52   :  { %375 = vmatpush3.bf16.msra.mxu0 %v68_v10 }
  0x55   :  { %377 = vmatmul.mubr.bf16.vlgmr.msra.gmra.mrb[0].mxu0 %v43_v1 }
 0x128   :  { %v103_v11 = vpop.f32.mrb[0].mxu0 }
 0x129   :  { %v109_v12 = vrot.slane %v103_v11, 4  ;;  %v116_v13 = vmul.f32 %v103_v11, %v103_v11  ;;  %v378_v14 = vpop.f32.mrb[1].mxu0 }
 0x12a   :  { %v106_v15 = vpop.f32.mrb[2].mxu0 }
 0x12b   :  { %v110_v16 = vadd.f32 %v109_v12, %v103_v11  ;;  %v117_v17 = vrot.slane %v116_v13, 4  ;;  %v379_v18 = vpop.f32.mrb[3].mxu0 }
 0x12d   :  { %v111_v19 = vrot.slane %v110_v16, 2  ;;  %v118_v20 = vadd.f32 %v117_v17, %v116_v13 }
 0x12f   :  { %v112_v21 = vadd.f32 %v111_v19, %v110_v16  ;;  %v119_v22 = vrot.slane %v118_v20, 2 }
 0x131   :  { %v113_v23 = vrot.slane %v112_v21, 1  ;;  %v120_v24 = vadd.f32 %v119_v22, %v118_v20 }
 0x133   :  { %v114_v25 = vadd.f32 %v113_v23, %v112_v21  ;;  %v121_v26 = vrot.slane %v120_v24, 1 }
 0x135   :  { %v115_v27 = vmul.f32 0.125, %v114_v25  ;;  %v122_v28 = vadd.f32 %v121_v26, %v120_v24 }
 0x137   :  { %v123_v29 = vmul.f32 0.125, %v122_v28  ;;  %v124_v30 = vmul.f32 %v115_v27, %v115_v27 }
 0x139   :  { %v125_v31 = vsub.f32 %v123_v29, %v124_v30 }
 0x13b   :  { %v126_v32 = vmax.f32 %v125_v31, 0.0 }
 0x13d   :  { %v129_v33 = vadd.f32 1e-05, %v126_v32 }
 0x13f   :  { %426 = vrsqrt.f32 %v129_v33 }
 0x149   :  { %v427_v38 = vpop.eup %426 }
 0x14a   :  { %v131_v39 = vmul.f32 %v427_v38, %v127_v36 }
 0x14c   :  { %v132_v41 = vmul.f32 %v131_v39, %v115_v27  ;;  %v137_v42 = vrot.slane %v131_v39, %v666_v37 }
 0x14e   :  { %v133_v43 = vsub.f32 %v128_v40, %v132_v41  ;;  %v138_v44 = vmul.f32 %v137_v42, %v103_v11 }
 0x150   :  { %v142_v45 = vrot.slane %v133_v43, %v666_v37 }
 0x152   :  { %v143_v46 = vadd.f32 %v142_v45, %v138_v44 }
 0x154   :  { %v144_v47 = vmax.f32 %v143_v46, 0.0 }
 0x156   :  { %v145_v48 = vpack.c.bf16 %v144_v47, %v144_v47 }
 0x157   :  { %544 = dma.done.wait [#allocation3 + $0x1], 1024 }
 0x158   :  { %545 = vsyncadd [#allocation3 + $0x1], 4294966272  ;;  %380 = vmatprep.subr.bf16.mxu1 %v553_v2  ;;  %396 = vmatprep.mubr.msk.bf16.mxu1 %vm554_vm0, %v553_v2  ;;  %s496_s16 = scalar_lea.hbm %s737_s3, 1024 }
 0x159   :  { %p497_p10 = scmp.ne.s32.totalorder %s737_s3, %s496_s16  ;;  %p500_p12 = scmp.lt.u32.totalorder %s496_s16, %s737_s3 }
 0x15b   :  { %p502_p13 = pnand %p500_p12, %p497_p10 }
 0x15d   :  { %505 = shalt.err (!%p502_p13)  }
 0x15e   :  { %517 = shalt.err (!%p470_p1)  }
 0x15f   :  { %158 = dma.hbm_to_vmem [thread:$0]  %s737_s3, 1024, %s603_s10, [#allocation3]  ;;  %v225_v17 = vld [vmem:[%s738_s4 + $0x2] sm:$0x1]  ;;  %v226_v20 = vld [vmem:[%s738_s4 + $0x3] sm:$0x1] }
 0x160   :  { %v159_v49 = vld [vmem:[#allocation2 + $0x40] sm:$0xff]  ;;  %v160_v50 = vld [vmem:[#allocation2 + $0x48] sm:$0xff]  ;;  %v161_v51 = vld [vmem:[#allocation2 + $0x50] sm:$0xff] }
 0x161   :  { %381 = vmatpush3.bf16.msra.mxu1 %v159_v49  ;;  %v162_v52 = vld [vmem:[#allocation2 + $0x58] sm:$0xff]  ;;  %v163_v53 = vld [vmem:[#allocation2 + $0x60] sm:$0xff]  ;;  %v164_v54 = vld [vmem:[#allocation2 + $0x68] sm:$0xff] }
 0x162   :  { %382 = vmatprep.subr.bf16.mxu1 %v553_v2  ;;  %v165_v55 = vld [vmem:[#allocation2 + $0x70] sm:$0xff]  ;;  %v166_v56 = vld [vmem:[#allocation2 + $0x78] sm:$0xff] }
 0x165   :  { %383 = vmatpush3.bf16.msra.mxu1 %v160_v50 }
 0x166   :  { %384 = vmatprep.subr.bf16.mxu1 %v553_v2 }
 0x169   :  { %385 = vmatpush3.bf16.msra.mxu1 %v161_v51 }
 0x16a   :  { %386 = vmatprep.subr.bf16.mxu1 %v553_v2 }
 0x16d   :  { %387 = vmatpush3.bf16.msra.mxu1 %v162_v52 }
 0x16e   :  { %388 = vmatprep.subr.bf16.mxu1 %v553_v2 }
 0x171   :  { %389 = vmatpush3.bf16.msra.mxu1 %v163_v53 }
 0x172   :  { %390 = vmatprep.subr.bf16.mxu1 %v553_v2 }
 0x175   :  { %391 = vmatpush3.bf16.msra.mxu1 %v164_v54 }
 0x176   :  { %392 = vmatprep.subr.bf16.mxu1 %v553_v2 }
 0x179   :  { %393 = vmatpush3.bf16.msra.mxu1 %v165_v55 }
 0x17a   :  { %394 = vmatprep.subr.bf16.mxu1 %v553_v2 }
 0x17d   :  { %395 = vmatpush3.bf16.msra.mxu1 %v166_v56 }
 0x180   :  { %397 = vmatmul.mubr.bf16.vlgmr.msra.gmra.mrb[0].mxu1 %v145_v48 }
 0x253   :  { %v201_v57 = vpop.f32.mrb[0].mxu1 }
 0x254   :  { %v207_v58 = vrot.slane %v201_v57, 4  ;;  %v214_v59 = vmul.f32 %v201_v57, %v201_v57  ;;  %v398_v60 = vpop.f32.mrb[1].mxu1 }
 0x255   :  { %v204_v61 = vpop.f32.mrb[2].mxu1 }
 0x256   :  { %v208_v62 = vadd.f32 %v207_v58, %v201_v57  ;;  %v215_v63 = vrot.slane %v214_v59, 4  ;;  %v399_v0 = vpop.f32.mrb[3].mxu1 }
 0x258   :  { %v209_v1 = vrot.slane %v208_v62, 2  ;;  %v216_v3 = vadd.f32 %v215_v63, %v214_v59 }
 0x25a   :  { %v210_v4 = vadd.f32 %v209_v1, %v208_v62  ;;  %v217_v5 = vrot.slane %v216_v3, 2 }
 0x25c   :  { %v211_v6 = vrot.slane %v210_v4, 1  ;;  %v218_v7 = vadd.f32 %v217_v5, %v216_v3 }
 0x25e   :  { %v212_v8 = vadd.f32 %v211_v6, %v210_v4  ;;  %v219_v9 = vrot.slane %v218_v7, 1 }
 0x260   :  { %v213_v10 = vmul.f32 0.125, %v212_v8  ;;  %v220_v11 = vadd.f32 %v219_v9, %v218_v7 }
 0x262   :  { %v221_v12 = vmul.f32 0.125, %v220_v11  ;;  %v222_v13 = vmul.f32 %v213_v10, %v213_v10 }
 0x264   :  { %v223_v14 = vsub.f32 %v221_v12, %v222_v13 }
 0x266   :  { %v224_v15 = vmax.f32 %v223_v14, 0.0 }
 0x268   :  { %v227_v16 = vadd.f32 1e-05, %v224_v15 }
 0x26a   :  { %428 = vrsqrt.f32 %v227_v16 }
 0x274   :  { %v429_v18 = vpop.eup %428 }
 0x275   :  { %v229_v19 = vmul.f32 %v429_v18, %v225_v17 }
 0x277   :  { %v230_v21 = vmul.f32 %v229_v19, %v213_v10  ;;  %v235_v22 = vrot.slane %v229_v19, %v666_v37 }
 0x279   :  { %v231_v23 = vsub.f32 %v226_v20, %v230_v21  ;;  %v236_v24 = vmul.f32 %v235_v22, %v201_v57 }
 0x27b   :  { %v240_v25 = vrot.slane %v231_v23, %v666_v37 }
 0x27d   :  { %v241_v26 = vadd.f32 %v240_v25, %v236_v24 }
 0x27f   :  { %v242_v27 = vmax.f32 %v241_v26, 0.0 }
 0x281   :  { %v243_v28 = vpack.c.bf16 %v242_v27, %v242_v27 }
 0x282   :  { %546 = dma.done.wait [#allocation3], 1024 }
 0x283   :  { %547 = vsyncadd [#allocation3], 4294966272  ;;  %400 = vmatprep.subr.bf16.mxu0 %v553_v2  ;;  %416 = vmatprep.mubr.msk.bf16.mxu0 %vm554_vm0, %v553_v2  ;;  %v246_v29 = vld [vmem:[#allocation2] sm:$0xff]  ;;  %v247_v30 = vld [vmem:[#allocation2 + $0x8] sm:$0xff]  ;;  %s555_s25 = smov [#allocation7]  }
 0x284   :  { %401 = vmatpush3.bf16.msra.mxu0 %v246_v29  ;;  %v248_v31 = vld [vmem:[#allocation2 + $0x10] sm:$0xff]  ;;  %v249_v32 = vld [vmem:[#allocation2 + $0x18] sm:$0xff]  ;;  %v250_v33 = vld [vmem:[#allocation2 + $0x20] sm:$0xff]  ;;  %s308_s26 = sshll.u32 %s555_s25, 4  ;;  %s309_s26 = int_to_ptr.vmem [resolvable:$true] %s308_s26 }
 0x285   :  { %402 = vmatprep.subr.bf16.mxu0 %v553_v2  ;;  %v251_v34 = vld [vmem:[#allocation2 + $0x28] sm:$0xff]  ;;  %v252_v35 = vld [vmem:[#allocation2 + $0x30] sm:$0xff]  ;;  %v253_v36 = vld [vmem:[#allocation2 + $0x38] sm:$0xff]  ;;  %s518_s27 = scalar_lea.vmem %s309_s26, 128  ;;  %p523_p0 = scmp.lt.s32.totalorder %s309_s26, %s309_s26 }
 0x286   :  { %v330_v37 = vld [vmem:[%s739_s5] ss:$0 sm:$0xff]  ;;  %p519_p11 = scmp.ne.s32.totalorder %s309_s26, %s518_s27  ;;  %p524_p1 = scmp.lt.s32.totalorder %s518_s27, %s518_s27 }
 0x288   :  { %403 = vmatpush3.bf16.msra.mxu0 %v247_v30  ;;  %p525_p2 = por %p524_p1, %p523_p0 }
 0x289   :  { %404 = vmatprep.subr.bf16.mxu0 %v553_v2 }
 0x28a   :  { %p526_p3 = pnand %p525_p2, %p519_p11 }
 0x28c   :  { %405 = vmatpush3.bf16.msra.mxu0 %v248_v31 }
 0x28d   :  { %406 = vmatprep.subr.bf16.mxu0 %v553_v2 }
 0x290   :  { %407 = vmatpush3.bf16.msra.mxu0 %v249_v32 }
 0x291   :  { %408 = vmatprep.subr.bf16.mxu0 %v553_v2 }
 0x294   :  { %409 = vmatpush3.bf16.msra.mxu0 %v250_v33 }
 0x295   :  { %410 = vmatprep.subr.bf16.mxu0 %v553_v2 }
 0x298   :  { %411 = vmatpush3.bf16.msra.mxu0 %v251_v34 }
 0x299   :  { %412 = vmatprep.subr.bf16.mxu0 %v553_v2 }
 0x29c   :  { %413 = vmatpush3.bf16.msra.mxu0 %v252_v35 }
 0x29d   :  { %414 = vmatprep.subr.bf16.mxu0 %v553_v2 }
 0x2a0   :  { %415 = vmatpush3.bf16.msra.mxu0 %v253_v36 }
 0x2a3   :  { %417 = vmatmul.mubr.bf16.vlgmr.msra.gmra.mrb[4].mxu0 %v243_v28 }
 0x376   :  { %v295_v38 = vpop.f32.mrb[4].mxu0 }
 0x377   :  { %v296_v39 = vadd.f32 %v330_v37, %v295_v38  ;;  %v418_v40 = vpop.f32.mrb[5].mxu0 }
 0x378   :  { %v298_v41 = vpop.f32.mrb[6].mxu0 }
 0x379   :  { %301 = vst [vmem:[#allocation7] sm:$0xff] %v296_v39  ;;  %v419_v42 = vpop.f32.mrb[7].mxu0 }
 0x37a   :  { %529 = shalt.err (!%p526_p3)
}
 0x37b   :  { %s530_s5 = scalar_lea.hbm %s740_s6, 128 }
 0x37c   :  { %p531_p4 = scmp.ne.s32.totalorder %s740_s6, %s530_s5  ;;  %p534_p5 = scmp.lt.u32.totalorder %s530_s5, %s740_s6 }
 0x37e   :  { %p536_p6 = pnand %p534_p5, %p531_p4 }
 0x380   :  { %539 = shalt.err (!%p536_p6)
}
 0x381   :  { %311 = dma.vmem_to_hbm [thread:$0]  %s309_s26, 128, %s740_s6, [#allocation6]  }
 0x382   :  { %548 = dma.done.wait [#allocation6], 128  }
 0x383   :  { %549 = vsyncadd [#allocation6], 4294967168 }
 0x384   :  { %315 = vsyncpa [#allocation5], 1 }
 0x385   :  { %316 = vsyncpa [#allocation6], 1 }
 0x386   :  { %317 = vsyncmov [#allocation3] }
 0x389   :  { %s318_s11 = vpop.sfrf %317 }
 0x38a   :  { %p331_p7 = scmp.ne.s32.totalorder %s318_s11, 0 }
 0x38c   :  { %322 = shalt.err (%p331_p7)  }
 0x38d   :  { %324 = vsyncmov [#allocation3 + $0x1] }
 0x390   :  { %s325_s12 = vpop.sfrf %324 }
 0x391   :  { %p332_p8 = scmp.ne.s32.totalorder %s325_s12, 0 }
 0x393   :  { %329 = shalt.err (%p332_p8)  }

</bundles_post_ra>
